<compile_context>
chip_gen: v5e
topology: v5e:2x2
jax: 0.10.0
libtpu: 0.0.40
codegen_flags: <defaults>
</compile_context>

<pallas_src>
import functools

import jax
import jax.numpy as jnp
from jax.experimental import pallas as pl
from jax.experimental.pallas import tpu as pltpu


def _rup(x, m):
    return (x + m - 1) // m * m


def _pick_tile(padded_dim, cap):
    """Largest multiple of 128 that divides padded_dim (a multiple of 128) and
    is <= cap."""
    t = (min(cap, padded_dim) // 128) * 128
    while padded_dim % t != 0:
        t -= 128
    return t


# ----------------------------------------------------------------------------
# Pallas kernel: tiled matmul with f32 accumulator, fused bias + Swish epilogue
# ----------------------------------------------------------------------------
def _matmul_bias_act_kernel(x_ref, w_ref, b_ref, o_ref, acc_ref, *, act):
    k = pl.program_id(2)

    @pl.when(k == 0)
    def _():
        acc_ref[...] = jnp.zeros_like(acc_ref)

    acc_ref[...] += jnp.dot(
        x_ref[...], w_ref[...], preferred_element_type=jnp.float32
    )

    @pl.when(k == pl.num_programs(2) - 1)
    def _():
        out = acc_ref[...] + b_ref[...]  # bias in f32, only on last K step
        if act == "swish":
            # x * sigmoid(x); exp and approx-reciprocal both go to the EUP slot
            out = out * pl.reciprocal(1.0 + jnp.exp(-out), approx=True)
        o_ref[...] = out.astype(o_ref.dtype)


def _matmul_bias_act(x_p, w_p, b_p, *, act, out_dtype, tm, tn, tk):
    """y = act(x_p @ w_p + b_p) on pre-padded operands.

    x_p:(Mp,Kp) bf16, w_p:(Kp,Np) bf16, b_p:(1,Np) f32.  Returns (Mp,Np) in
    out_dtype.  f32 accumulation / epilogue.
    """
    Mp, Kp = x_p.shape
    Kp2, Np = w_p.shape
    assert Kp == Kp2 and b_p.shape == (1, Np)
    assert Mp % tm == 0 and Np % tn == 0 and Kp % tk == 0

    grid = (Mp // tm, Np // tn, Kp // tk)

    out_itemsize = jnp.dtype(out_dtype).itemsize
    cost = pl.CostEstimate(
        flops=2 * Mp * Kp * Np,
        transcendentals=(Mp * Np if act == "swish" else 0),
        bytes_accessed=(
            Mp * Kp * 2 + Kp * Np * 2 + Np * 4 + Mp * Np * out_itemsize
        ),
    )

    return pl.pallas_call(
        functools.partial(_matmul_bias_act_kernel, act=act),
        out_shape=jax.ShapeDtypeStruct((Mp, Np), out_dtype),
        grid_spec=pltpu.PrefetchScalarGridSpec(
            num_scalar_prefetch=0,
            grid=grid,
            in_specs=[
                pl.BlockSpec((tm, tk), lambda i, j, k: (i, k)),
                pl.BlockSpec((tk, tn), lambda i, j, k: (k, j)),
                pl.BlockSpec((1, tn), lambda i, j, k: (0, j)),
            ],
            out_specs=pl.BlockSpec((tm, tn), lambda i, j, k: (i, j)),
            scratch_shapes=[pltpu.VMEM((tm, tn), jnp.float32)],
        ),
        compiler_params=pltpu.CompilerParams(
            dimension_semantics=("parallel", "parallel", "arbitrary"),
            vmem_limit_bytes=48 * 1024 * 1024,
        ),
        cost_estimate=cost,
    )(x_p, w_p, b_p)


# ----------------------------------------------------------------------------
# FeedForward module (pure function over params); weight prep done once at init
# ----------------------------------------------------------------------------
def init_feed_forward(key, dim, mult=4, *, tm_max=256, tn_max=512, tk_max=512):
    hidden = dim * mult
    k1, k2, k3, k4 = jax.random.split(key, 4)
    # PyTorch Linear stores (out, in); we store weights pre-transposed to
    # (in, out), pre-padded to lane multiples and pre-cast to bf16 ONCE here.
    w1 = 0.05 * jax.random.normal(k1, (dim, hidden), dtype=jnp.float32)
    b1 = 0.01 * jax.random.normal(k2, (hidden,), dtype=jnp.float32)
    w2 = 0.05 * jax.random.normal(k3, (hidden, dim), dtype=jnp.float32)
    b2 = 0.01 * jax.random.normal(k4, (dim,), dtype=jnp.float32)

    Dp = _rup(dim, 128)
    Hp = _rup(hidden, 128)

    w1_p = jnp.pad(w1, ((0, Dp - dim), (0, Hp - hidden))).astype(jnp.bfloat16)
    b1_p = jnp.pad(b1.reshape(1, hidden), ((0, 0), (0, Hp - hidden)))
    w2_p = jnp.pad(w2, ((0, Hp - hidden), (0, Dp - dim))).astype(jnp.bfloat16)
    b2_p = jnp.pad(b2.reshape(1, dim), ((0, 0), (0, Dp - dim)))

    return {
        # prepared kernel operands
        "w1_p": w1_p, "b1_p": b1_p.astype(jnp.float32),
        "w2_p": w2_p, "b2_p": b2_p.astype(jnp.float32),
        # static config (tiles chosen once; all divide the padded dims)
        "dim": dim, "hidden": hidden, "Dp": Dp, "Hp": Hp,
        "tm_max": tm_max,
        "tk1": _pick_tile(Dp, tk_max), "tn1": _pick_tile(Hp, tn_max),
        "tk2": _pick_tile(Hp, tk_max), "tn2": _pick_tile(Dp, tn_max),
        # unpadded f32 copies kept only for the reference check
        "w1": w1, "b1": b1, "w2": w2, "b2": b2,
    }


def feed_forward(params, x):
    """x: (B, S, D) -> (B, S, D).  Matches nn.Sequential(Linear, Swish,
    Dropout(0.0), Linear, Dropout(0.0)) forward."""
    B, S, D = x.shape
    dim, Dp = params["dim"], params["Dp"]
    assert D == dim

    M = B * S
    tm = min(params["tm_max"], _rup(M, 16))
    Mp = _rup(M, tm)

    x2d = x.reshape(M, D)
    # Single pad + bf16 cast of the activation (pad elided when aligned).
    if (Mp, Dp) != (M, D):
        x2d = jnp.pad(x2d, ((0, Mp - M), (0, Dp - D)))
    x_p = x2d.astype(jnp.bfloat16)

    # Linear -> Swish: padded bf16 hidden stays resident, fed straight into
    # the second matmul (no slice / re-pad / re-cast of the 4x-wide hidden).
    h_p = _matmul_bias_act(
        x_p, params["w1_p"], params["b1_p"], act="swish",
        out_dtype=jnp.bfloat16, tm=tm, tn=params["tn1"], tk=params["tk1"])
    # TODO(synk): Dropout with p>0.0 (training mode) not implemented; p=0.0 here so it is the identity.
    out_p = _matmul_bias_act(
        h_p, params["w2_p"], params["b2_p"], act=None,
        out_dtype=jnp.float32, tm=tm, tn=params["tn2"], tk=params["tk2"])

    return out_p[:M, :D].reshape(B, S, D)


if __name__ == "__main__":
    key = jax.random.PRNGKey(0)
    k_param, k_x = jax.random.split(key)

    # Small deterministic input: (batch=2, seq=8, dim=32), mult=4 -> hidden=128.
    B, S, dim, mult = 2, 8, 32, 4
    x = jax.random.normal(k_x, (B, S, dim), dtype=jnp.float32)

    params = init_feed_forward(k_param, dim, mult)

    out = jax.block_until_ready(feed_forward(params, x))

    # Plain-JAX f32 reference (bf16 MXU operands + bf16 hidden -> loose tol).
    def ref(p, xx):
        h = xx @ p["w1"] + p["b1"]
        h = h * jax.nn.sigmoid(h)
        return h @ p["w2"] + p["b2"]

    expected = ref(params, x)
    assert out.shape == (B, S, dim)
    err = float(jnp.max(jnp.abs(out - expected)))
    assert err < 5e-2, f"mismatch vs reference: max abs err {err}"

    print("KERNEL_OK")
</pallas_src>

<mosaic_0001>
module attributes {stable_mosaic.version = 11 : i64} {
  func.func @_matmul_bias_act_kernel(%arg0: i32, %arg1: i32, %arg2: i32, %arg3: memref<16x128xbf16, #tpu.memory_space<vmem>>, %arg4: memref<128x128xbf16, #tpu.memory_space<vmem>>, %arg5: memref<1x128xf32, #tpu.memory_space<vmem>>, %arg6: memref<16x128xbf16, #tpu.memory_space<vmem>>, %arg7: memref<16x128xf32, #tpu.memory_space<vmem>>) attributes {dimension_semantics = [#tpu.dimension_semantics<parallel>, #tpu.dimension_semantics<parallel>, #tpu.dimension_semantics<arbitrary>], iteration_bounds = array<i64: 1, 1, 1>, scalar_prefetch = 0 : i64, scratch_operands = 1 : i64, tpu.core_type = #tpu.core_type<tc>, window_params = [{transform_indices = @transform_0, window_bounds = array<i64: 16, 128>}, {transform_indices = @transform_1, window_bounds = array<i64: 128, 128>}, {transform_indices = @transform_2, window_bounds = array<i64: 1, 128>}, {transform_indices = @transform_3, window_bounds = array<i64: 16, 128>}]} {
    %c0_i32 = arith.constant 0 : i32
    %0 = arith.cmpi eq, %arg2, %c0_i32 : i32
    %1 = arith.extui %0 : i1 to i32
    %c0_i32_0 = arith.constant 0 : i32
    %2 = arith.cmpi ne, %1, %c0_i32_0 : i32
    scf.if %2 {
      %cst_10 = arith.constant 0.000000e+00 : f32
      %12 = vector.broadcast %cst_10 : f32 to vector<16x128xf32>
      %c0_11 = arith.constant 0 : index
      %c0_12 = arith.constant 0 : index
      %13 = vector.load %arg7[%c0_11, %c0_12] : memref<16x128xf32, #tpu.memory_space<vmem>>, vector<16x128xf32>
      tpu.vector_store %arg7[%c0_11, %c0_12], %12 {strides = array<i32>} : memref<16x128xf32, #tpu.memory_space<vmem>>, vector<16x128xf32>,
    } else {
    }
    %c0 = arith.constant 0 : index
    %c0_1 = arith.constant 0 : index
    %3 = vector.load %arg7[%c0, %c0_1] : memref<16x128xf32, #tpu.memory_space<vmem>>, vector<16x128xf32>
    %c0_2 = arith.constant 0 : index
    %c0_3 = arith.constant 0 : index
    %4 = vector.load %arg3[%c0_2, %c0_3] : memref<16x128xbf16, #tpu.memory_space<vmem>>, vector<16x128xbf16>
    %c0_4 = arith.constant 0 : index
    %c0_5 = arith.constant 0 : index
    %5 = vector.load %arg4[%c0_4, %c0_5] : memref<128x128xbf16, #tpu.memory_space<vmem>>, vector<128x128xbf16>
    %cst = arith.constant dense<0.000000e+00> : vector<16x128xf32>
    %6 = tpu.matmul %4, %5, %cst {dimension_numbers = #tpu.dot_dimension_numbers<[1], [0], [0], [1], [0, 0, 1, 1], [], []>} : vector<16x128xbf16>, vector<128x128xbf16>, vector<16x128xf32> -> vector<16x128xf32>
    %7 = arith.addf %3, %6 : vector<16x128xf32>
    %c0_6 = arith.constant 0 : index
    %c0_7 = arith.constant 0 : index
    %8 = vector.load %arg7[%c0_6, %c0_7] : memref<16x128xf32, #tpu.memory_space<vmem>>, vector<16x128xf32>
    tpu.vector_store %arg7[%c0_6, %c0_7], %7 {strides = array<i32>} : memref<16x128xf32, #tpu.memory_space<vmem>>, vector<16x128xf32>,
    %c0_i32_8 = arith.constant 0 : i32
    %9 = arith.cmpi eq, %arg2, %c0_i32_8 : i32
    %10 = arith.extui %9 : i1 to i32
    %c0_i32_9 = arith.constant 0 : i32
    %11 = arith.cmpi ne, %10, %c0_i32_9 : i32
    scf.if %11 {
      %c0_10 = arith.constant 0 : index
      %c0_11 = arith.constant 0 : index
      %12 = vector.load %arg7[%c0_10, %c0_11] : memref<16x128xf32, #tpu.memory_space<vmem>>, vector<16x128xf32>
      %c0_12 = arith.constant 0 : index
      %c0_13 = arith.constant 0 : index
      %13 = vector.load %arg5[%c0_12, %c0_13] : memref<1x128xf32, #tpu.memory_space<vmem>>, vector<1x128xf32>
      %14 = vector.broadcast %13 : vector<1x128xf32> to vector<16x128xf32>
      %15 = arith.addf %12, %14 : vector<16x128xf32>
      %cst_14 = arith.constant 0.000000e+00 : f32
      %16 = vector.broadcast %cst_14 : f32 to vector<16x128xf32>
      %17 = arith.subf %16, %15 : vector<16x128xf32>
      %18 = math.exp %17 : vector<16x128xf32>
      %cst_15 = arith.constant 1.000000e+00 : f32
      %19 = vector.broadcast %cst_15 : f32 to vector<16x128xf32>
      %20 = arith.addf %19, %18 : vector<16x128xf32>
      %21 = tpu.reciprocal %20 {approx = true} : vector<16x128xf32> -> vector<16x128xf32>
      %22 = arith.mulf %15, %21 : vector<16x128xf32>
      %23 = arith.truncf %22 : vector<16x128xf32> to vector<16x128xbf16>
      %c0_16 = arith.constant 0 : index
      %c0_17 = arith.constant 0 : index
      %24 = vector.load %arg6[%c0_16, %c0_17] : memref<16x128xbf16, #tpu.memory_space<vmem>>, vector<16x128xbf16>
      tpu.vector_store %arg6[%c0_16, %c0_17], %23 {strides = array<i32>} : memref<16x128xbf16, #tpu.memory_space<vmem>>, vector<16x128xbf16>,
    } else {
    }
    return
  }
  func.func @transform_0(%arg0: i32, %arg1: i32, %arg2: i32) -> (i32, i32) {
    %c0_i32 = arith.constant 0 : i32
    return %arg0, %arg2 : i32, i32
  }
  func.func @transform_1(%arg0: i32, %arg1: i32, %arg2: i32) -> (i32, i32) {
    %c0_i32 = arith.constant 0 : i32
    return %arg2, %arg1 : i32, i32
  }
  func.func @transform_2(%arg0: i32, %arg1: i32, %arg2: i32) -> (i32, i32) {
    %c0_i32 = arith.constant 0 : i32
    %c0_i32_0 = arith.constant 0 : i32
    return %c0_i32, %arg1 : i32, i32
  }
  func.func @transform_3(%arg0: i32, %arg1: i32, %arg2: i32) -> (i32, i32) {
    %c0_i32 = arith.constant 0 : i32
    return %arg0, %arg1 : i32, i32
  }
}

</mosaic_0001>

<bundles_post_ra>
// kernel: tpu_custom_call.1
= control target key start
LH: loop header
LB: loop body
LE: loop exit
PB: predicated region body
PF: predicated region fallthrough
CT: control target
= control target key end

     0   :  { %8 = vsyncpa [#allocation4], 0  ;;  %s380_s0 = inlined_call_operand.hbm [shape: bf16[16,128], index: 0, kind: input, shape index: {}]   ;;  %s381_s1 = inlined_call_operand.hbm [shape: bf16[128,128], index: 1, kind: input, shape index: {}]   ;;  %s382_s2 = inlined_call_operand.vmem [shape: f32[1,128], index: 2, kind: input, shape index: {}]   ;;  %s383_s3 = inlined_call_operand.hbm [shape: bf16[16,128], index: 3, kind: output, shape index: {}]  }
   0x1   :  { %9 = vsyncpa [#allocation7], 0 }
   0x2   :  { %10 = vsyncpa [#allocation5], 0  ;;  %s15_s14 = sshll.u32 %s380_s0, 4  ;;  %s334_s15 = smov [#allocation3]   ;;  %s16_s14 = int_to_ptr.hbm [resolvable:$true] %s15_s14 }
   0x3   :  { %s17_s16 = sshll.u32 %s334_s15, 4  ;;  %s28_s19 = sshll.u32 %s381_s1, 4  ;;  %s18_s16 = int_to_ptr.vmem [resolvable:$true] %s17_s16  ;;  %s29_s19 = int_to_ptr.hbm [resolvable:$true] %s28_s19 }
   0x4   :  { %s335_s20 = smov 64   ;;  %s336_s21 = smov 4  }
   0x5   :  { %23 = dma.hbm_to_vmem [thread:$0]  %s16_s14, 128, %s18_s16, [#allocation4], %s335_s20, %s335_s20, %s336_s21  }
   0x6   :  { %s337_s22 = smov [#allocation6]  }
   0x7   :  { %s30_s23 = sshll.u32 %s337_s22, 4  ;;  %s31_s23 = int_to_ptr.vmem [resolvable:$true] %s30_s23 }
   0x8   :  { %36 = dma.hbm_to_vmem [thread:$0]  %s29_s19, 1024, %s31_s23, [#allocation7], %s335_s20, %s335_s20, %s336_s21  }
   0x9   :  { %328 = dma.done.wait [#allocation4], 128  }
   0xa   :  { %329 = vsyncadd [#allocation4], 4294967168 }
   0xb   :  { %330 = dma.done.wait [#allocation7], 1024  }
   0xc   :  { %331 = vsyncadd [#allocation7], 4294966272  ;;  %v236_v0 = vld [vmem:[#allocation6 + $0x38] sm:$0xff]  ;;  %v235_v1 = vld [vmem:[#allocation6 + $0x30] sm:$0xff]  ;;  %s338_s24 = smov [#allocation8]   ;;  %s178_s27 = sshll.u32 %s383_s3, 4  ;;  %s179_s27 = int_to_ptr.hbm [resolvable:$true] %s178_s27 }
   0xd   :  { %127 = vmatpush.bf16.msra.mxu0 %v236_v0  ;;  %v234_v2 = vld [vmem:[#allocation6 + $0x28] sm:$0xff]  ;;  %v233_v3 = vld [vmem:[#allocation6 + $0x20] sm:$0xff]  ;;  %v232_v4 = vld [vmem:[#allocation6 + $0x18] sm:$0xff] }
   0xe   :  { %v231_v5 = vld [vmem:[#allocation6 + $0x10] sm:$0xff]  ;;  %v230_v6 = vld [vmem:[#allocation6 + $0x8] sm:$0xff]  ;;  %v229_v7 = vld [vmem:[#allocation6] sm:$0xff] }
   0xf   :  { %v228_v8 = vld [vmem:[#allocation3] sm:$0xff] }
  0x10   :  { %v247_v9 = vld [vmem:[%s382_s2] ss:$0 sm:$0xff]  ;;  %s176_s2 = sshll.u32 %s338_s24, 4  ;;  %s177_s2 = int_to_ptr.vmem [resolvable:$true] %s176_s2 }
  0x11   :  { %128 = vmatpush.bf16.msra.mxu0 %v235_v1 }
  0x15   :  { %129 = vmatpush.bf16.msra.mxu0 %v234_v2 }
  0x19   :  { %130 = vmatpush.bf16.msra.mxu0 %v233_v3 }
  0x1d   :  { %131 = vmatpush.bf16.msra.mxu0 %v232_v4 }
  0x21   :  { %132 = vmatpush.bf16.msra.mxu0 %v231_v5 }
  0x25   :  { %133 = vmatpush.bf16.msra.mxu0 %v230_v6 }
  0x29   :  { %134 = vmatpush.bf16.msra.mxu0 %v229_v7 }
  0x2c   :  { %135 = vmatmul.bf16.vlgmr.msra.gmra.mxu0 %v228_v8 }
  0xa9   :  { %v136_v10 = vpop.f32.mrf.mxu0 }
  0xaa   :  { %v154_v11 = vadd.f32 %v247_v9, %v136_v10 }
  0xac   :  { %v156_v12 = vsub.f32 0.0, %v154_v11 }
  0xae   :  { %v158_v13 = vmul.f32 1.442695, %v156_v12 }
  0xb0   :  { %248 = vpow2.f32 %v158_v13 }
  0xb1   :  { %v138_v14 = vpop.f32.mrf.mxu0 }
  0xb2   :  { %v155_v15 = vadd.f32 %v247_v9, %v138_v14 }
  0xb4   :  { %v157_v16 = vsub.f32 0.0, %v155_v15 }
  0xb6   :  { %v160_v17 = vmul.f32 1.442695, %v157_v16  ;;  %v249_v18 = vpop.eup %248 }
  0xb7   :  { %v162_v19 = vadd.f32 1.0, %v249_v18 }
  0xb8   :  { %250 = vpow2.f32 %v160_v17 }
  0xb9   :  { %252 = vrcp.f32 %v162_v19 }
  0xbe   :  { %v251_v20 = vpop.eup %250 }
  0xbf   :  { %v163_v21 = vadd.f32 1.0, %v251_v20  ;;  %v253_v22 = vpop.eup %252 }
  0xc0   :  { %v166_v24 = vmul.f32 %v253_v22, %v154_v11 }
  0xc1   :  { %254 = vrcp.f32 %v163_v21 }
  0xc7   :  { %v255_v23 = vpop.eup %254 }
  0xc8   :  { %v167_v25 = vmul.f32 %v255_v23, %v155_v15 }
  0xca   :  { %v240_v26 = vpack.c.bf16 %v167_v25, %v166_v24 }
  0xcc   :  { %241 = vst [vmem:[#allocation8] sm:$0xff] %v240_v26  }
  0xcd   :  { %184 = dma.vmem_to_hbm [thread:$0]  %s177_s2, 128, %s179_s27, [#allocation5], %s335_s20, %s335_s20, %s336_s21  }
  0xce   :  { %332 = dma.done.wait [#allocation5], 128  }
  0xcf   :  { %333 = vsyncadd [#allocation5], 4294967168 }
  0xd0   :  { %189 = vsyncpa [#allocation4], 1 }
  0xd1   :  { %190 = vsyncpa [#allocation7], 1 }
  0xd2   :  { %191 = vsyncpa [#allocation5], 1 }

</bundles_post_ra>
